<compile_context>
chip_gen: v7x
topology: tpu7x:2x2x1
jax: 0.10.0
libtpu: 0.0.40
codegen_flags: <defaults>
</compile_context>

<pallas_src>
import functools
import math

import jax
import jax.numpy as jnp
from jax.experimental import pallas as pl
from jax.experimental.pallas import tpu as pltpu


def _conv3x3_maxpool2x2_kernel(xq_ref, w_ref, b_ref, o_ref, *, NB, Ho, Wo, Cin, Cout):
    # xq_ref: (NB, Hp, Wp, 4*Cin)   space-to-depth padded input, channels minor
    # w_ref:  (4, 4, 4*Cin, Cout)   [output parity, window, fused input channel, Cout]
    # b_ref:  (1, Cout)             conv bias (f32)
    # o_ref:  (NB, Ho*Wo, Cout)     pooled output (row-major spatial, channels minor)
    M = NB * Ho * Wo
    K = 4 * Cin

    # Hoist the 4 shifted windows once — shared by all four output parities.
    # (Ho, Wo) collapse is layout-preserving for Wo % 8 == 0; minor dim unchanged.
    wins = []
    for s in range(2):
        for t in range(2):
            win = xq_ref[:, s:s + Ho, t:t + Wo, :]          # (NB, Ho, Wo, 4*Cin)
            wins.append(win.reshape(M, K))

    pooled = None
    for po in range(4):                                     # pooled-pixel parity pa*2+pb
        acc = jnp.dot(wins[0], w_ref[po, 0], preferred_element_type=jnp.float32)
        for widx in range(1, 4):
            acc = acc + jnp.dot(wins[widx], w_ref[po, widx],
                                preferred_element_type=jnp.float32)
        pooled = acc if pooled is None else jnp.maximum(pooled, acc)

    # Per-channel bias is constant over each pool window, so add after the max.
    out = pooled + b_ref[...]
    o_ref[...] = out.reshape(NB, Ho * Wo, Cout).astype(o_ref.dtype)


def _pick_images_per_step(n, bytes_per_image):
    """Largest divisor of n that keeps >=2 grid steps (v7x has 2 TCs) and a small block."""
    budget = 4 * 1024 * 1024          # conservative per-step input-block budget
    nb = 1
    for cand in range(1, n + 1):
        if n % cand:
            continue
        if n >= 2 and n // cand < 2:  # keep both TensorCores busy on v7x
            continue
        if cand * bytes_per_image > budget:
            continue
        nb = cand
    return nb


def downsample_block_forward(x, conv_w, conv_b):
    """maxpool2x2(conv3x3_same(x; conv_w, conv_b)) for NCHW x — DownSampleBlock.forward."""
    N, C, H, W = x.shape
    Cout, Cin, KH, KW = conv_w.shape
    assert (Cin, KH, KW) == (C, 3, 3) and H % 2 == 0 and W % 2 == 0
    Ho, Wo = H // 2, W // 2
    Hp, Wp = Ho + 1, Wo + 1
    out_dtype = x.dtype

    # --- wrapper-side layout prep (XLA), data stays in the input dtype -----------------
    xpad = jnp.pad(x, ((0, 0), (0, 0), (1, 1), (1, 1)))            # (N, C, H+2, W+2)
    xq = (xpad.reshape(N, C, Hp, 2, Wp, 2)
              .transpose(0, 2, 4, 3, 5, 1)                         # (N, Hp, Wp, 2, 2, C)
              .reshape(N, Hp, Wp, 4 * C))

    # Per (output parity, window) dense weight blocks: fold the 2x2 input parity into K.
    wt = jnp.transpose(conv_w, (2, 3, 1, 0))                       # (3, 3, Cin, Cout)
    w4 = jnp.zeros((4, 4, 4 * C, Cout), dtype=conv_w.dtype)
    for pa in range(2):
        for pb in range(2):
            for s in range(2):
                for t in range(2):
                    for p in range(2):
                        for q in range(2):
                            dy, dx = 2 * s + p - pa, 2 * t + q - pb
                            if 0 <= dy <= 2 and 0 <= dx <= 2:
                                pq = p * 2 + q
                                w4 = w4.at[pa * 2 + pb, s * 2 + t,
                                           pq * C:(pq + 1) * C, :].set(wt[dy, dx])
    b2 = conv_b.astype(jnp.float32).reshape(1, Cout)

    NB = _pick_images_per_step(N, Hp * Wp * 4 * C * x.dtype.itemsize)
    G = N // NB

    kernel = functools.partial(_conv3x3_maxpool2x2_kernel,
                               NB=NB, Ho=Ho, Wo=Wo, Cin=C, Cout=Cout)

    flops = 2 * N * Ho * Wo * 16 * (4 * C) * Cout
    bytes_accessed = int(xq.size * xq.dtype.itemsize + w4.size * w4.dtype.itemsize
                         + b2.size * 4 + N * Ho * Wo * Cout * jnp.dtype(out_dtype).itemsize)

    out = pl.pallas_call(
        kernel,
        out_shape=jax.ShapeDtypeStruct((N, Ho * Wo, Cout), out_dtype),
        grid_spec=pltpu.PrefetchScalarGridSpec(
            num_scalar_prefetch=0,
            grid=(G,),
            in_specs=[
                pl.BlockSpec((NB, Hp, Wp, 4 * C), lambda g: (g, 0, 0, 0)),
                pl.BlockSpec((4, 4, 4 * C, Cout), lambda g: (0, 0, 0, 0)),
                pl.BlockSpec((1, Cout), lambda g: (0, 0)),
            ],
            out_specs=pl.BlockSpec((NB, Ho * Wo, Cout), lambda g: (g, 0, 0)),
        ),
        compiler_params=pltpu.CompilerParams(
            dimension_semantics=("parallel",),
        ),
        cost_estimate=pl.CostEstimate(
            flops=flops, transcendentals=0, bytes_accessed=bytes_accessed),
    )(xq, w4, b2)

    return out.reshape(N, Ho, Wo, Cout).transpose(0, 3, 1, 2)      # back to NCHW


def _reference_forward(x, conv_w, conv_b):
    y = jax.lax.conv_general_dilated(
        x, conv_w, window_strides=(1, 1), padding=((1, 1), (1, 1)),
        dimension_numbers=("NCHW", "OIHW", "NCHW"),
        precision=jax.lax.Precision.HIGHEST)
    y = y + conv_b[None, :, None, None]
    return jax.lax.reduce_window(y, -jnp.inf, jax.lax.max,
                                 (1, 1, 2, 2), (1, 1, 2, 2), "VALID")


if __name__ == "__main__":
    key = jax.random.PRNGKey(0)
    kx, kw, kb = jax.random.split(key, 3)
    N, C, H, W = 2, 4, 16, 16
    x = jax.random.normal(kx, (N, C, H, W), dtype=jnp.float32)
    fan_in = C * 3 * 3
    conv_w = jax.random.normal(kw, (C, C, 3, 3), dtype=jnp.float32) / math.sqrt(fan_in)
    conv_b = 0.1 * jax.random.normal(kb, (C,), dtype=jnp.float32)

    y = jax.jit(downsample_block_forward)(x, conv_w, conv_b)
    jax.block_until_ready(y)

    y_ref = _reference_forward(x, conv_w, conv_b)
    assert y.shape == (N, C, H // 2, W // 2) and y.dtype == x.dtype
    assert jnp.allclose(y, y_ref, atol=1e-2, rtol=1e-2), float(
        jnp.max(jnp.abs(y - y_ref)))
    print("KERNEL_OK")
</pallas_src>

<mosaic_0001>
module attributes {stable_mosaic.version = 11 : i64} {
  func.func @_conv3x3_maxpool2x2_kernel(%arg0: i32, %arg1: memref<1x9x9x16xf32, #tpu.memory_space<vmem>>, %arg2: memref<4x4x16x4xf32, #tpu.memory_space<vmem>>, %arg3: memref<1x4xf32, #tpu.memory_space<vmem>>, %arg4: memref<1x64x4xf32, #tpu.memory_space<vmem>>) attributes {dimension_semantics = [#tpu.dimension_semantics<parallel>], iteration_bounds = array<i64: 2>, scalar_prefetch = 0 : i64, scratch_operands = 0 : i64, tpu.core_type = #tpu.core_type<tc>, window_params = [{transform_indices = @transform_0, window_bounds = array<i64: 1, 9, 9, 16>}, {pipeline_mode = #tpu.pipeline_mode<synchronous>, transform_indices = @transform_1, window_bounds = array<i64: 4, 4, 16, 4>}, {pipeline_mode = #tpu.pipeline_mode<synchronous>, transform_indices = @transform_2, window_bounds = array<i64: 1, 4>}, {transform_indices = @transform_3, window_bounds = array<i64: 1, 64, 4>}]} {
    %c0 = arith.constant 0 : index
    %c0_0 = arith.constant 0 : index
    %c0_1 = arith.constant 0 : index
    %c0_2 = arith.constant 0 : index
    %0 = vector.load %arg1[%c0, %c0_0, %c0_1, %c0_2] : memref<1x9x9x16xf32, #tpu.memory_space<vmem>>, vector<1x8x8x16xf32>
    %1 = vector.shape_cast %0 : vector<1x8x8x16xf32> to vector<64x16xf32>
    %c0_3 = arith.constant 0 : index
    %c0_4 = arith.constant 0 : index
    %c1 = arith.constant 1 : index
    %c0_5 = arith.constant 0 : index
    %2 = vector.load %arg1[%c0_3, %c0_4, %c1, %c0_5] : memref<1x9x9x16xf32, #tpu.memory_space<vmem>>, vector<1x8x8x16xf32>
    %3 = vector.shape_cast %2 : vector<1x8x8x16xf32> to vector<64x16xf32>
    %c0_6 = arith.constant 0 : index
    %c1_7 = arith.constant 1 : index
    %c0_8 = arith.constant 0 : index
    %c0_9 = arith.constant 0 : index
    %4 = vector.load %arg1[%c0_6, %c1_7, %c0_8, %c0_9] : memref<1x9x9x16xf32, #tpu.memory_space<vmem>>, vector<1x8x8x16xf32>
    %5 = vector.shape_cast %4 : vector<1x8x8x16xf32> to vector<64x16xf32>
    %c0_10 = arith.constant 0 : index
    %c1_11 = arith.constant 1 : index
    %c1_12 = arith.constant 1 : index
    %c0_13 = arith.constant 0 : index
    %6 = vector.load %arg1[%c0_10, %c1_11, %c1_12, %c0_13] : memref<1x9x9x16xf32, #tpu.memory_space<vmem>>, vector<1x8x8x16xf32>
    %7 = vector.shape_cast %6 : vector<1x8x8x16xf32> to vector<64x16xf32>
    %c0_14 = arith.constant 0 : index
    %c0_15 = arith.constant 0 : index
    %c0_16 = arith.constant 0 : index
    %c0_17 = arith.constant 0 : index
    %8 = vector.load %arg2[%c0_14, %c0_15, %c0_16, %c0_17] : memref<4x4x16x4xf32, #tpu.memory_space<vmem>>, vector<1x1x16x4xf32>
    %9 = vector.shape_cast %8 : vector<1x1x16x4xf32> to vector<16x4xf32>
    %cst = arith.constant dense<0.000000e+00> : vector<64x4xf32>
    %10 = tpu.matmul %1, %9, %cst {dimension_numbers = #tpu.dot_dimension_numbers<[1], [0], [0], [1], [0, 0, 1, 1], [], []>} : vector<64x16xf32>, vector<16x4xf32>, vector<64x4xf32> -> vector<64x4xf32>
    %c0_18 = arith.constant 0 : index
    %c1_19 = arith.constant 1 : index
    %c0_20 = arith.constant 0 : index
    %c0_21 = arith.constant 0 : index
    %11 = vector.load %arg2[%c0_18, %c1_19, %c0_20, %c0_21] : memref<4x4x16x4xf32, #tpu.memory_space<vmem>>, vector<1x1x16x4xf32>
    %12 = vector.shape_cast %11 : vector<1x1x16x4xf32> to vector<16x4xf32>
    %cst_22 = arith.constant dense<0.000000e+00> : vector<64x4xf32>
    %13 = tpu.matmul %3, %12, %cst_22 {dimension_numbers = #tpu.dot_dimension_numbers<[1], [0], [0], [1], [0, 0, 1, 1], [], []>} : vector<64x16xf32>, vector<16x4xf32>, vector<64x4xf32> -> vector<64x4xf32>
    %14 = arith.addf %10, %13 : vector<64x4xf32>
    %c0_23 = arith.constant 0 : index
    %c2 = arith.constant 2 : index
    %c0_24 = arith.constant 0 : index
    %c0_25 = arith.constant 0 : index
    %15 = vector.load %arg2[%c0_23, %c2, %c0_24, %c0_25] : memref<4x4x16x4xf32, #tpu.memory_space<vmem>>, vector<1x1x16x4xf32>
    %16 = vector.shape_cast %15 : vector<1x1x16x4xf32> to vector<16x4xf32>
    %cst_26 = arith.constant dense<0.000000e+00> : vector<64x4xf32>
    %17 = tpu.matmul %5, %16, %cst_26 {dimension_numbers = #tpu.dot_dimension_numbers<[1], [0], [0], [1], [0, 0, 1, 1], [], []>} : vector<64x16xf32>, vector<16x4xf32>, vector<64x4xf32> -> vector<64x4xf32>
    %18 = arith.addf %14, %17 : vector<64x4xf32>
    %c0_27 = arith.constant 0 : index
    %c3 = arith.constant 3 : index
    %c0_28 = arith.constant 0 : index
    %c0_29 = arith.constant 0 : index
    %19 = vector.load %arg2[%c0_27, %c3, %c0_28, %c0_29] : memref<4x4x16x4xf32, #tpu.memory_space<vmem>>, vector<1x1x16x4xf32>
    %20 = vector.shape_cast %19 : vector<1x1x16x4xf32> to vector<16x4xf32>
    %cst_30 = arith.constant dense<0.000000e+00> : vector<64x4xf32>
    %21 = tpu.matmul %7, %20, %cst_30 {dimension_numbers = #tpu.dot_dimension_numbers<[1], [0], [0], [1], [0, 0, 1, 1], [], []>} : vector<64x16xf32>, vector<16x4xf32>, vector<64x4xf32> -> vector<64x4xf32>
    %22 = arith.addf %18, %21 : vector<64x4xf32>
    %c1_31 = arith.constant 1 : index
    %c0_32 = arith.constant 0 : index
    %c0_33 = arith.constant 0 : index
    %c0_34 = arith.constant 0 : index
    %23 = vector.load %arg2[%c1_31, %c0_32, %c0_33, %c0_34] : memref<4x4x16x4xf32, #tpu.memory_space<vmem>>, vector<1x1x16x4xf32>
    %24 = vector.shape_cast %23 : vector<1x1x16x4xf32> to vector<16x4xf32>
    %cst_35 = arith.constant dense<0.000000e+00> : vector<64x4xf32>
    %25 = tpu.matmul %1, %24, %cst_35 {dimension_numbers = #tpu.dot_dimension_numbers<[1], [0], [0], [1], [0, 0, 1, 1], [], []>} : vector<64x16xf32>, vector<16x4xf32>, vector<64x4xf32> -> vector<64x4xf32>
    %c1_36 = arith.constant 1 : index
    %c1_37 = arith.constant 1 : index
    %c0_38 = arith.constant 0 : index
    %c0_39 = arith.constant 0 : index
    %26 = vector.load %arg2[%c1_36, %c1_37, %c0_38, %c0_39] : memref<4x4x16x4xf32, #tpu.memory_space<vmem>>, vector<1x1x16x4xf32>
    %27 = vector.shape_cast %26 : vector<1x1x16x4xf32> to vector<16x4xf32>
    %cst_40 = arith.constant dense<0.000000e+00> : vector<64x4xf32>
    %28 = tpu.matmul %3, %27, %cst_40 {dimension_numbers = #tpu.dot_dimension_numbers<[1], [0], [0], [1], [0, 0, 1, 1], [], []>} : vector<64x16xf32>, vector<16x4xf32>, vector<64x4xf32> -> vector<64x4xf32>
    %29 = arith.addf %25, %28 : vector<64x4xf32>
    %c1_41 = arith.constant 1 : index
    %c2_42 = arith.constant 2 : index
    %c0_43 = arith.constant 0 : index
    %c0_44 = arith.constant 0 : index
    %30 = vector.load %arg2[%c1_41, %c2_42, %c0_43, %c0_44] : memref<4x4x16x4xf32, #tpu.memory_space<vmem>>, vector<1x1x16x4xf32>
    %31 = vector.shape_cast %30 : vector<1x1x16x4xf32> to vector<16x4xf32>
    %cst_45 = arith.constant dense<0.000000e+00> : vector<64x4xf32>
    %32 = tpu.matmul %5, %31, %cst_45 {dimension_numbers = #tpu.dot_dimension_numbers<[1], [0], [0], [1], [0, 0, 1, 1], [], []>} : vector<64x16xf32>, vector<16x4xf32>, vector<64x4xf32> -> vector<64x4xf32>
    %33 = arith.addf %29, %32 : vector<64x4xf32>
    %c1_46 = arith.constant 1 : index
    %c3_47 = arith.constant 3 : index
    %c0_48 = arith.constant 0 : index
    %c0_49 = arith.constant 0 : index
    %34 = vector.load %arg2[%c1_46, %c3_47, %c0_48, %c0_49] : memref<4x4x16x4xf32, #tpu.memory_space<vmem>>, vector<1x1x16x4xf32>
    %35 = vector.shape_cast %34 : vector<1x1x16x4xf32> to vector<16x4xf32>
    %cst_50 = arith.constant dense<0.000000e+00> : vector<64x4xf32>
    %36 = tpu.matmul %7, %35, %cst_50 {dimension_numbers = #tpu.dot_dimension_numbers<[1], [0], [0], [1], [0, 0, 1, 1], [], []>} : vector<64x16xf32>, vector<16x4xf32>, vector<64x4xf32> -> vector<64x4xf32>
    %37 = arith.addf %33, %36 : vector<64x4xf32>
    %38 = arith.maximumf %22, %37 : vector<64x4xf32>
    %c2_51 = arith.constant 2 : index
    %c0_52 = arith.constant 0 : index
    %c0_53 = arith.constant 0 : index
    %c0_54 = arith.constant 0 : index
    %39 = vector.load %arg2[%c2_51, %c0_52, %c0_53, %c0_54] : memref<4x4x16x4xf32, #tpu.memory_space<vmem>>, vector<1x1x16x4xf32>
    %40 = vector.shape_cast %39 : vector<1x1x16x4xf32> to vector<16x4xf32>
    %cst_55 = arith.constant dense<0.000000e+00> : vector<64x4xf32>
    %41 = tpu.matmul %1, %40, %cst_55 {dimension_numbers = #tpu.dot_dimension_numbers<[1], [0], [0], [1], [0, 0, 1, 1], [], []>} : vector<64x16xf32>, vector<16x4xf32>, vector<64x4xf32> -> vector<64x4xf32>
    %c2_56 = arith.constant 2 : index
    %c1_57 = arith.constant 1 : index
    %c0_58 = arith.constant 0 : index
    %c0_59 = arith.constant 0 : index
    %42 = vector.load %arg2[%c2_56, %c1_57, %c0_58, %c0_59] : memref<4x4x16x4xf32, #tpu.memory_space<vmem>>, vector<1x1x16x4xf32>
    %43 = vector.shape_cast %42 : vector<1x1x16x4xf32> to vector<16x4xf32>
    %cst_60 = arith.constant dense<0.000000e+00> : vector<64x4xf32>
    %44 = tpu.matmul %3, %43, %cst_60 {dimension_numbers = #tpu.dot_dimension_numbers<[1], [0], [0], [1], [0, 0, 1, 1], [], []>} : vector<64x16xf32>, vector<16x4xf32>, vector<64x4xf32> -> vector<64x4xf32>
    %45 = arith.addf %41, %44 : vector<64x4xf32>
    %c2_61 = arith.constant 2 : index
    %c2_62 = arith.constant 2 : index
    %c0_63 = arith.constant 0 : index
    %c0_64 = arith.constant 0 : index
    %46 = vector.load %arg2[%c2_61, %c2_62, %c0_63, %c0_64] : memref<4x4x16x4xf32, #tpu.memory_space<vmem>>, vector<1x1x16x4xf32>
    %47 = vector.shape_cast %46 : vector<1x1x16x4xf32> to vector<16x4xf32>
    %cst_65 = arith.constant dense<0.000000e+00> : vector<64x4xf32>
    %48 = tpu.matmul %5, %47, %cst_65 {dimension_numbers = #tpu.dot_dimension_numbers<[1], [0], [0], [1], [0, 0, 1, 1], [], []>} : vector<64x16xf32>, vector<16x4xf32>, vector<64x4xf32> -> vector<64x4xf32>
    %49 = arith.addf %45, %48 : vector<64x4xf32>
    %c2_66 = arith.constant 2 : index
    %c3_67 = arith.constant 3 : index
    %c0_68 = arith.constant 0 : index
    %c0_69 = arith.constant 0 : index
    %50 = vector.load %arg2[%c2_66, %c3_67, %c0_68, %c0_69] : memref<4x4x16x4xf32, #tpu.memory_space<vmem>>, vector<1x1x16x4xf32>
    %51 = vector.shape_cast %50 : vector<1x1x16x4xf32> to vector<16x4xf32>
    %cst_70 = arith.constant dense<0.000000e+00> : vector<64x4xf32>
    %52 = tpu.matmul %7, %51, %cst_70 {dimension_numbers = #tpu.dot_dimension_numbers<[1], [0], [0], [1], [0, 0, 1, 1], [], []>} : vector<64x16xf32>, vector<16x4xf32>, vector<64x4xf32> -> vector<64x4xf32>
    %53 = arith.addf %49, %52 : vector<64x4xf32>
    %54 = arith.maximumf %38, %53 : vector<64x4xf32>
    %c3_71 = arith.constant 3 : index
    %c0_72 = arith.constant 0 : index
    %c0_73 = arith.constant 0 : index
    %c0_74 = arith.constant 0 : index
    %55 = vector.load %arg2[%c3_71, %c0_72, %c0_73, %c0_74] : memref<4x4x16x4xf32, #tpu.memory_space<vmem>>, vector<1x1x16x4xf32>
    %56 = vector.shape_cast %55 : vector<1x1x16x4xf32> to vector<16x4xf32>
    %cst_75 = arith.constant dense<0.000000e+00> : vector<64x4xf32>
    %57 = tpu.matmul %1, %56, %cst_75 {dimension_numbers = #tpu.dot_dimension_numbers<[1], [0], [0], [1], [0, 0, 1, 1], [], []>} : vector<64x16xf32>, vector<16x4xf32>, vector<64x4xf32> -> vector<64x4xf32>
    %c3_76 = arith.constant 3 : index
    %c1_77 = arith.constant 1 : index
    %c0_78 = arith.constant 0 : index
    %c0_79 = arith.constant 0 : index
    %58 = vector.load %arg2[%c3_76, %c1_77, %c0_78, %c0_79] : memref<4x4x16x4xf32, #tpu.memory_space<vmem>>, vector<1x1x16x4xf32>
    %59 = vector.shape_cast %58 : vector<1x1x16x4xf32> to vector<16x4xf32>
    %cst_80 = arith.constant dense<0.000000e+00> : vector<64x4xf32>
    %60 = tpu.matmul %3, %59, %cst_80 {dimension_numbers = #tpu.dot_dimension_numbers<[1], [0], [0], [1], [0, 0, 1, 1], [], []>} : vector<64x16xf32>, vector<16x4xf32>, vector<64x4xf32> -> vector<64x4xf32>
    %61 = arith.addf %57, %60 : vector<64x4xf32>
    %c3_81 = arith.constant 3 : index
    %c2_82 = arith.constant 2 : index
    %c0_83 = arith.constant 0 : index
    %c0_84 = arith.constant 0 : index
    %62 = vector.load %arg2[%c3_81, %c2_82, %c0_83, %c0_84] : memref<4x4x16x4xf32, #tpu.memory_space<vmem>>, vector<1x1x16x4xf32>
    %63 = vector.shape_cast %62 : vector<1x1x16x4xf32> to vector<16x4xf32>
    %cst_85 = arith.constant dense<0.000000e+00> : vector<64x4xf32>
    %64 = tpu.matmul %5, %63, %cst_85 {dimension_numbers = #tpu.dot_dimension_numbers<[1], [0], [0], [1], [0, 0, 1, 1], [], []>} : vector<64x16xf32>, vector<16x4xf32>, vector<64x4xf32> -> vector<64x4xf32>
    %65 = arith.addf %61, %64 : vector<64x4xf32>
    %c3_86 = arith.constant 3 : index
    %c3_87 = arith.constant 3 : index
    %c0_88 = arith.constant 0 : index
    %c0_89 = arith.constant 0 : index
    %66 = vector.load %arg2[%c3_86, %c3_87, %c0_88, %c0_89] : memref<4x4x16x4xf32, #tpu.memory_space<vmem>>, vector<1x1x16x4xf32>
    %67 = vector.shape_cast %66 : vector<1x1x16x4xf32> to vector<16x4xf32>
    %cst_90 = arith.constant dense<0.000000e+00> : vector<64x4xf32>
    %68 = tpu.matmul %7, %67, %cst_90 {dimension_numbers = #tpu.dot_dimension_numbers<[1], [0], [0], [1], [0, 0, 1, 1], [], []>} : vector<64x16xf32>, vector<16x4xf32>, vector<64x4xf32> -> vector<64x4xf32>
    %69 = arith.addf %65, %68 : vector<64x4xf32>
    %70 = arith.maximumf %54, %69 : vector<64x4xf32>
    %c0_91 = arith.constant 0 : index
    %c0_92 = arith.constant 0 : index
    %71 = vector.load %arg3[%c0_91, %c0_92] : memref<1x4xf32, #tpu.memory_space<vmem>>, vector<1x4xf32>
    %72 = vector.broadcast %71 : vector<1x4xf32> to vector<64x4xf32>
    %73 = arith.addf %70, %72 : vector<64x4xf32>
    %74 = vector.shape_cast %73 : vector<64x4xf32> to vector<1x64x4xf32>
    %c0_93 = arith.constant 0 : index
    %c0_94 = arith.constant 0 : index
    %c0_95 = arith.constant 0 : index
    %75 = vector.load %arg4[%c0_93, %c0_94, %c0_95] : memref<1x64x4xf32, #tpu.memory_space<vmem>>, vector<1x64x4xf32>
    tpu.vector_store %arg4[%c0_93, %c0_94, %c0_95], %74 {strides = array<i32>} : memref<1x64x4xf32, #tpu.memory_space<vmem>>, vector<1x64x4xf32>,
    return
  }
  func.func @transform_0(%arg0: i32) -> (i32, i32, i32, i32) {
    %c0_i32 = arith.constant 0 : i32
    %c0_i32_0 = arith.constant 0 : i32
    %c0_i32_1 = arith.constant 0 : i32
    %c0_i32_2 = arith.constant 0 : i32
    return %arg0, %c0_i32, %c0_i32_0, %c0_i32_1 : i32, i32, i32, i32
  }
  func.func @transform_1(%arg0: i32) -> (i32, i32, i32, i32) {
    %c0_i32 = arith.constant 0 : i32
    %c0_i32_0 = arith.constant 0 : i32
    %c0_i32_1 = arith.constant 0 : i32
    %c0_i32_2 = arith.constant 0 : i32
    %c0_i32_3 = arith.constant 0 : i32
    return %c0_i32, %c0_i32_0, %c0_i32_1, %c0_i32_2 : i32, i32, i32, i32
  }
  func.func @transform_2(%arg0: i32) -> (i32, i32) {
    %c0_i32 = arith.constant 0 : i32
    %c0_i32_0 = arith.constant 0 : i32
    %c0_i32_1 = arith.constant 0 : i32
    return %c0_i32, %c0_i32_0 : i32, i32
  }
  func.func @transform_3(%arg0: i32) -> (i32, i32, i32) {
    %c0_i32 = arith.constant 0 : i32
    %c0_i32_0 = arith.constant 0 : i32
    %c0_i32_1 = arith.constant 0 : i32
    return %arg0, %c0_i32, %c0_i32_0 : i32, i32, i32
  }
}

</mosaic_0001>

<bundles_post_ra>
// kernel: downsample_block_forward.1
= control target key start
LH: loop header
LB: loop body
LE: loop exit
PB: predicated region body
PF: predicated region fallthrough
CT: control target
= control target key end

     0   :  { %s2994_s12 = smov 0   ;;  %s3444_s0 = inlined_call_operand.vmem [shape: f32[2,9,9,16], index: 0, kind: input, shape index: {}]   ;;  %s3445_s1 = inlined_call_operand.vmem [shape: f32[4,4,16,4], index: 1, kind: input, shape index: {}]   ;;  %s3446_s2 = inlined_call_operand.vmem [shape: f32[1,4], index: 2, kind: input, shape index: {}]   ;;  %s3447_s3 = inlined_call_operand.vmem [shape: f32[2,64,4], index: 3, kind: output, shape index: {}]  }
   0x1 LB: > { %s2195_s13 = sadd.s32 4294967295, %s2972_s12   ;;  %p2199_p0 = scmp.ge.s32.totalorder %s2972_s12, 1  ;;  %s2972_s12 = sphi %s2994_s12, %s13_s12  }
   0x2   : > { %p137_p1 = scmp.lt.s32.totalorder %s2972_s12, 3 }
   0x4   : > { %p138_p2 = pnand %p2199_p0, %p137_p1 }
   0x5   : > { %v2219_v0 = vld [vmem:[%s3445_s1 + $0x10] sm:$0xff] (!%p138_p2)  ;;  %v2220_v1 = vld [vmem:[%s3445_s1 + $0x18] sm:$0xff] (!%p138_p2)  ;;  %p161_p3 = scmp.lt.s32.totalorder (!%p138_p2), %s2195_s13, 1  ;;  %v204_v5 = vld [vmem:[%s3445_s1] sm:$0xff] (!%p138_p2)  ;;  %vm209_vm0 = vcmask (!%p138_p2), 130048   ;;  %vm2131_vm1 = vcmask (!%p138_p2), 31744  }
   0x6   : > { %141 = sbr.rel (%p138_p2) target bundleno = 363 (0x16b), region = 32  ;;  %v2259_v2 = vld [vmem:[%s3445_s1 + $0x50] sm:$0xff] (!%p138_p2)  ;;  %v2797_v3 = vpack.c.bf16 (!%p138_p2), %v2220_v1, %v2219_v0  ;;  %v2260_v4 = vld [vmem:[%s3445_s1 + $0x58] sm:$0xff] (!%p138_p2)  ;;  %v205_v6 = vld [vmem:[%s3445_s1 + $0x8] sm:$0xff] (!%p138_p2) }
   0x7   : > { %v2813_v7 = vpack.c.bf16 (!%p138_p2), %v2260_v4, %v2259_v2  ;;  %v2801_v8 = vpack.c.bf16 (!%p138_p2), %v205_v6, %v204_v5  ;;  %v2257_v9 = vld [vmem:[%s3445_s1 + $0x40] sm:$0xff] (!%p138_p2)  ;;  %v2258_v10 = vld [vmem:[%s3445_s1 + $0x48] sm:$0xff] (!%p138_p2)  ;;  %v2247_v27 = vld [vmem:[%s3445_s1 + $0x30] sm:$0xff] (!%p138_p2) }
   0x8   : > { %2798 = vmatprep.subr.bf16.mxu0 (!%p138_p2), %v2797_v3  ;;  %v2817_v11 = vpack.c.bf16 (!%p138_p2), %v2258_v10, %v2257_v9  ;;  %v2237_v12 = vld [vmem:[%s3445_s1 + $0x20] sm:$0xff] (!%p138_p2)  ;;  %v2238_v13 = vld [vmem:[%s3445_s1 + $0x28] sm:$0xff] (!%p138_p2)  ;;  %v2248_v28 = vld [vmem:[%s3445_s1 + $0x38] sm:$0xff] (!%p138_p2) }
   0x9   : > { %2800 = vmatpush3.bf16.msra.mxu0 (!%p138_p2), %v2797_v3  ;;  %2814 = vmatprep.subr.bf16.mxu1 (!%p138_p2), %v2813_v7  ;;  %v2277_v14 = vld [vmem:[%s3445_s1 + $0x60] sm:$0xff] (!%p138_p2)  ;;  %v2278_v15 = vld [vmem:[%s3445_s1 + $0x68] sm:$0xff] (!%p138_p2)  ;;  %v2805_v19 = vpack.c.bf16 (!%p138_p2), %v2238_v13, %v2237_v12  ;;  %v2287_v29 = vld [vmem:[%s3445_s1 + $0x70] sm:$0xff] (!%p138_p2)  ;;  %v2809_v33 = vpack.c.bf16 (!%p138_p2), %v2248_v28, %v2247_v27 }
   0xa   : > { %2816 = vmatpush3.bf16.msra.mxu1 (!%p138_p2), %v2813_v7  ;;  %2802 = vmatprep.subr.bf16.mxu0 (!%p138_p2), %v2801_v8  ;;  %v2821_v20 = vpack.c.bf16 (!%p138_p2), %v2278_v15, %v2277_v14  ;;  %v2288_v30 = vld [vmem:[%s3445_s1 + $0x78] sm:$0xff] (!%p138_p2)  ;;  %v2299_v40 = vld [vmem:[%s3445_s1 + $0x90] sm:$0xff] (!%p138_p2)  ;;  %v2297_v47 = vld [vmem:[%s3445_s1 + $0x80] sm:$0xff] (!%p138_p2) }
   0xb   : > { %2818 = vmatprep.subr.bf16.mxu1 (!%p138_p2), %v2817_v11  ;;  %v2825_v34 = vpack.c.bf16 (!%p138_p2), %v2288_v30, %v2287_v29  ;;  %v2300_v41 = vld [vmem:[%s3445_s1 + $0x98] sm:$0xff] (!%p138_p2)  ;;  %v2339_v42 = vld [vmem:[%s3445_s1 + $0xd0] sm:$0xff] (!%p138_p2)  ;;  %v2298_v48 = vld [vmem:[%s3445_s1 + $0x88] sm:$0xff] (!%p138_p2) }
   0xc   : > { %v2340_v43 = vld [vmem:[%s3445_s1 + $0xd8] sm:$0xff] (!%p138_p2)  ;;  %v2829_v44 = vpack.c.bf16 (!%p138_p2), %v2300_v41, %v2299_v40  ;;  %v2337_v49 = vld [vmem:[%s3445_s1 + $0xc0] sm:$0xff] (!%p138_p2)  ;;  %v2338_v50 = vld [vmem:[%s3445_s1 + $0xc8] sm:$0xff] (!%p138_p2)  ;;  %v2833_v51 = vpack.c.bf16 (!%p138_p2), %v2298_v48, %v2297_v47 }
   0xd   : > { %s3449_s13 = smov (!%p161_p3, %s2195_s13), 1  ;;  %v2845_v45 = vpack.c.bf16 %v2340_v43, %v2339_v42  ;;  %v2849_v52 = vpack.c.bf16 %v2338_v50, %v2337_v49  ;;  %v2317_v54 = vld [vmem:[%s3445_s1 + $0xa0] sm:$0xff]  ;;  %v2318_v55 = vld [vmem:[%s3445_s1 + $0xa8] sm:$0xff]  ;;  %v2327_v60 = vld [vmem:[%s3445_s1 + $0xb0] sm:$0xff] }
   0xe   : > { %s2957_s30 = smul.u32 144, %s3449_s13  ;;  %v2357_v56 = vld [vmem:[%s3445_s1 + $0xe0] sm:$0xff]  ;;  %v2358_v57 = vld [vmem:[%s3445_s1 + $0xe8] sm:$0xff]  ;;  %v2837_v58 = vpack.c.bf16 %v2318_v55, %v2317_v54  ;;  %v2328_v61 = vld [vmem:[%s3445_s1 + $0xb8] sm:$0xff]  ;;  %s2380_s5 = sshll.u32 %s3449_s13, 6 }
   0xf   : > { %v2853_v59 = vpack.c.bf16 %v2358_v57, %v2357_v56  ;;  %v2367_v62 = vld [vmem:[%s3445_s1 + $0xf0] sm:$0xff]  ;;  %v2368_v63 = vld [vmem:[%s3445_s1 + $0xf8] sm:$0xff]  ;;  %v2841_v0 = vpack.c.bf16 %v2328_v61, %v2327_v60  ;;  %s3423_s10 = scalar_lea.vmem %s3447_s3, %s2380_s5 }
  0x10   : > { %s3044_s16 = scalar_lea.vmem %s3444_s0, %s2957_s30  ;;  %v2857_v1 = vpack.c.bf16 %v2368_v63, %v2367_v62 }
  0x11   : > { %v3047_v16 = vld [vmem:[%s3044_s16 + $0x1] sm:$0xff]  ;;  %v3050_v17 = vld [vmem:[%s3044_s16 + $0x11] sm:$0xff] }
  0x12   : > { %2545 = vmatprep.mubr.msk.f32.mxu0 %vm209_vm0, %v3047_v16  ;;  %2609 = vmatprep.mubr.msk.f32.mxu1 %vm209_vm0, %v3047_v16  ;;  %v3057_v18 = vld [vmem:[%s3044_s16 + $0x21] sm:$0xff]  ;;  %v3064_v21 = vld [vmem:[%s3044_s16 + $0x31] sm:$0xff] }
  0x13   : > { %2546 = vmatmul.mubr.msk.f32.vlgmr.msra.gmra.mrb[0].mxu0 %vm209_vm0, %v3050_v17  ;;  %2610 = vmatmul.mubr.msk.f32.vlgmr.msra.gmra.mrb[0].mxu1 %vm209_vm0, %v3050_v17  ;;  %v3071_v22 = vld [vmem:[%s3044_s16 + $0x41] sm:$0xff]  ;;  %v3082_v23 = vld [vmem:[%s3044_s16 + $0x51] sm:$0xff] }
  0x14   : > { %2804 = vmatpush3.bf16.msra.mxu0 %v2801_v8  ;;  %2820 = vmatpush3.bf16.msra.mxu1 %v2817_v11  ;;  %v3085_v24 = vld [vmem:[%s3044_s16 + $0x61] sm:$0xff]  ;;  %v3096_v25 = vld [vmem:[%s3044_s16 + $0x71] sm:$0xff] }
  0x15   : > { %2548 = vmatprep.mubr.msk.f32.mxu0 %vm209_vm0, %v3057_v18  ;;  %2612 = vmatprep.mubr.msk.f32.mxu1 %vm209_vm0, %v3057_v18  ;;  %v3099_v26 = vld [vmem:[%s3044_s16] sm:$0xff]  ;;  %v3122_v31 = vld [vmem:[%s3044_s16 + $0x10] sm:$0xff] }
  0x16   : > { %2806 = vmatprep.subr.bf16.mxu0 %v2805_v19  ;;  %2822 = vmatprep.subr.bf16.mxu1 %v2821_v20  ;;  %v3125_v32 = vld [vmem:[%s3044_s16 + $0x20] sm:$0xff]  ;;  %v3132_v35 = vld [vmem:[%s3044_s16 + $0x30] sm:$0xff] }
  0x17   : > { %2549 = vmatmul.mubr.msk.f32.gmra.mrb[2].mxu0 %vm209_vm0, %v3064_v21  ;;  %2613 = vmatmul.mubr.msk.f32.gmra.mrb[2].mxu1 %vm209_vm0, %v3064_v21  ;;  %v3139_v36 = vld [vmem:[%s3044_s16 + $0x40] sm:$0xff]  ;;  %v3150_v37 = vld [vmem:[%s3044_s16 + $0x50] sm:$0xff] }
  0x18   : > { %2551 = vmatprep.mubr.msk.f32.mxu0 %vm209_vm0, %v3071_v22  ;;  %2615 = vmatprep.mubr.msk.f32.mxu1 %vm209_vm0, %v3071_v22  ;;  %v3153_v38 = vld [vmem:[%s3044_s16 + $0x60] sm:$0xff]  ;;  %v3164_v39 = vld [vmem:[%s3044_s16 + $0x70] sm:$0xff] }
  0x19   : > { %v3211_v46 = vld [vmem:[%s3044_s16 + $0x80] sm:$0xff] }
  0x1a   : > { %v3258_v53 = vld [vmem:[%s3044_s16 + $0x81] sm:$0xff] }
  0x1b   : > { %2552 = vmatmul.mubr.msk.f32.gmra.mrb[4].mxu0 %vm209_vm0, %v3082_v23  ;;  %2616 = vmatmul.mubr.msk.f32.gmra.mrb[4].mxu1 %vm209_vm0, %v3082_v23 }
  0x1c   : > { %2554 = vmatprep.mubr.msk.f32.mxu0 %vm209_vm0, %v3085_v24  ;;  %2618 = vmatprep.mubr.msk.f32.mxu1 %vm209_vm0, %v3085_v24 }
  0x1f   : > { %2555 = vmatmul.mubr.msk.f32.gmra.mrb[6].mxu0 %vm209_vm0, %v3096_v25  ;;  %2619 = vmatmul.mubr.msk.f32.gmra.mrb[6].mxu1 %vm209_vm0, %v3096_v25 }
  0x20   : > { %2561 = vmatprep.mubr.msk.f32.mxu0 %vm209_vm0, %v3099_v26  ;;  %2625 = vmatprep.mubr.msk.f32.mxu1 %vm209_vm0, %v3099_v26 }
  0x23   : > { %2562 = vmatmul.mubr.msk.f32.vlgmr.msra.gmra.mrb[0].mxu0 %vm209_vm0, %v3122_v31  ;;  %2626 = vmatmul.mubr.msk.f32.vlgmr.msra.gmra.mrb[0].mxu1 %vm209_vm0, %v3122_v31 }
  0x24   : > { %2808 = vmatpush3.bf16.msra.mxu0 %v2805_v19  ;;  %2824 = vmatpush3.bf16.msra.mxu1 %v2821_v20 }
  0x25   : > { %2564 = vmatprep.mubr.msk.f32.mxu0 %vm209_vm0, %v3125_v32  ;;  %2628 = vmatprep.mubr.msk.f32.mxu1 %vm209_vm0, %v3125_v32 }
  0x26   : > { %2810 = vmatprep.subr.bf16.mxu0 %v2809_v33  ;;  %2826 = vmatprep.subr.bf16.mxu1 %v2825_v34 }
  0x27   : > { %2565 = vmatmul.mubr.msk.f32.gmra.mrb[2].mxu0 %vm209_vm0, %v3132_v35  ;;  %2629 = vmatmul.mubr.msk.f32.gmra.mrb[2].mxu1 %vm209_vm0, %v3132_v35 }
  0x28   : > { %2567 = vmatprep.mubr.msk.f32.mxu0 %vm209_vm0, %v3139_v36  ;;  %2631 = vmatprep.mubr.msk.f32.mxu1 %vm209_vm0, %v3139_v36 }
  0x2b   : > { %2568 = vmatmul.mubr.msk.f32.gmra.mrb[4].mxu0 %vm209_vm0, %v3150_v37  ;;  %2632 = vmatmul.mubr.msk.f32.gmra.mrb[4].mxu1 %vm209_vm0, %v3150_v37 }
  0x2c   : > { %2570 = vmatprep.mubr.msk.f32.mxu0 %vm209_vm0, %v3153_v38  ;;  %2634 = vmatprep.mubr.msk.f32.mxu1 %vm209_vm0, %v3153_v38 }
  0x2f   : > { %2571 = vmatmul.mubr.msk.f32.gmra.mrb[6].mxu0 %vm209_vm0, %v3164_v39  ;;  %2635 = vmatmul.mubr.msk.f32.gmra.mrb[6].mxu1 %vm209_vm0, %v3164_v39 }
  0x30   : > { %2577 = vmatprep.mubr.msk.f32.mxu0 %vm209_vm0, %v3122_v31  ;;  %2641 = vmatprep.mubr.msk.f32.mxu1 %vm209_vm0, %v3122_v31 }
  0x33   : > { %2578 = vmatmul.mubr.msk.f32.vlgmr.msra.gmra.mrb[0].mxu0 %vm209_vm0, %v3125_v32  ;;  %2642 = vmatmul.mubr.msk.f32.vlgmr.msra.gmra.mrb[0].mxu1 %vm209_vm0, %v3125_v32 }
  0x34   : > { %2812 = vmatpush3.bf16.msra.mxu0 %v2809_v33  ;;  %2828 = vmatpush3.bf16.msra.mxu1 %v2825_v34 }
  0x35   : > { %2580 = vmatprep.mubr.msk.f32.mxu0 %vm209_vm0, %v3132_v35  ;;  %2644 = vmatprep.mubr.msk.f32.mxu1 %vm209_vm0, %v3132_v35 }
  0x36   : > { %2830 = vmatprep.subr.bf16.mxu0 %v2829_v44  ;;  %2846 = vmatprep.subr.bf16.mxu1 %v2845_v45 }
  0x37   : > { %2581 = vmatmul.mubr.msk.f32.gmra.mrb[2].mxu0 %vm209_vm0, %v3139_v36  ;;  %2645 = vmatmul.mubr.msk.f32.gmra.mrb[2].mxu1 %vm209_vm0, %v3139_v36 }
  0x38   : > { %2583 = vmatprep.mubr.msk.f32.mxu0 %vm209_vm0, %v3150_v37  ;;  %2647 = vmatprep.mubr.msk.f32.mxu1 %vm209_vm0, %v3150_v37 }
  0x3b   : > { %2584 = vmatmul.mubr.msk.f32.gmra.mrb[4].mxu0 %vm209_vm0, %v3153_v38  ;;  %2648 = vmatmul.mubr.msk.f32.gmra.mrb[4].mxu1 %vm209_vm0, %v3153_v38 }
  0x3c   : > { %2586 = vmatprep.mubr.msk.f32.mxu0 %vm209_vm0, %v3164_v39  ;;  %2650 = vmatprep.mubr.msk.f32.mxu1 %vm209_vm0, %v3164_v39 }
  0x3f   : > { %2587 = vmatmul.mubr.msk.f32.gmra.mrb[6].mxu0 %vm209_vm0, %v3211_v46  ;;  %2651 = vmatmul.mubr.msk.f32.gmra.mrb[6].mxu1 %vm209_vm0, %v3211_v46 }
  0x40   : > { %2593 = vmatprep.mubr.msk.f32.mxu0 %vm209_vm0, %v3050_v17  ;;  %2657 = vmatprep.mubr.msk.f32.mxu1 %vm209_vm0, %v3050_v17 }
  0x43   : > { %2594 = vmatmul.mubr.msk.f32.vlgmr.msra.gmra.mrb[0].mxu0 %vm209_vm0, %v3057_v18  ;;  %2658 = vmatmul.mubr.msk.f32.vlgmr.msra.gmra.mrb[0].mxu1 %vm209_vm0, %v3057_v18 }
  0x44   : > { %2832 = vmatpush3.bf16.msra.mxu0 %v2829_v44  ;;  %2848 = vmatpush3.bf16.msra.mxu1 %v2845_v45 }
  0x45   : > { %2596 = vmatprep.mubr.msk.f32.mxu0 %vm209_vm0, %v3064_v21  ;;  %2660 = vmatprep.mubr.msk.f32.mxu1 %vm209_vm0, %v3064_v21 }
  0x46   : > { %2834 = vmatprep.subr.bf16.mxu0 %v2833_v51  ;;  %2850 = vmatprep.subr.bf16.mxu1 %v2849_v52 }
  0x47   : > { %2597 = vmatmul.mubr.msk.f32.gmra.mrb[2].mxu0 %vm209_vm0, %v3071_v22  ;;  %2661 = vmatmul.mubr.msk.f32.gmra.mrb[2].mxu1 %vm209_vm0, %v3071_v22 }
  0x48   : > { %2599 = vmatprep.mubr.msk.f32.mxu0 %vm209_vm0, %v3082_v23  ;;  %2663 = vmatprep.mubr.msk.f32.mxu1 %vm209_vm0, %v3082_v23 }
  0x4b   : > { %2600 = vmatmul.mubr.msk.f32.gmra.mrb[4].mxu0 %vm209_vm0, %v3085_v24  ;;  %2664 = vmatmul.mubr.msk.f32.gmra.mrb[4].mxu1 %vm209_vm0, %v3085_v24 }
  0x4c   : > { %2602 = vmatprep.mubr.msk.f32.mxu0 %vm209_vm0, %v3096_v25  ;;  %2666 = vmatprep.mubr.msk.f32.mxu1 %vm209_vm0, %v3096_v25 }
  0x4f   : > { %2603 = vmatmul.mubr.msk.f32.gmra.mrb[6].mxu0 %vm209_vm0, %v3258_v53  ;;  %2667 = vmatmul.mubr.msk.f32.gmra.mrb[6].mxu1 %vm209_vm0, %v3258_v53 }
  0x50   : > { %2673 = vmatprep.mubr.msk.f32.mxu0 %vm209_vm0, %v3047_v16  ;;  %2737 = vmatprep.mubr.msk.f32.mxu1 %vm209_vm0, %v3047_v16 }
  0x53   : > { %2674 = vmatmul.mubr.msk.f32.vlgmr.msra.gmra.mrb[8].mxu0 %vm209_vm0, %v3050_v17  ;;  %2738 = vmatmul.mubr.msk.f32.vlgmr.msra.gmra.mrb[8].mxu1 %vm209_vm0, %v3050_v17 }
  0x54   : > { %2836 = vmatpush3.bf16.msra.mxu0 %v2833_v51  ;;  %2852 = vmatpush3.bf16.msra.mxu1 %v2849_v52 }
  0x55   : > { %2676 = vmatprep.mubr.msk.f32.mxu0 %vm209_vm0, %v3057_v18  ;;  %2740 = vmatprep.mubr.msk.f32.mxu1 %vm209_vm0, %v3057_v18 }
  0x56   : > { %2838 = vmatprep.subr.bf16.mxu0 %v2837_v58  ;;  %2854 = vmatprep.subr.bf16.mxu1 %v2853_v59 }
  0x57   : > { %2677 = vmatmul.mubr.msk.f32.gmra.mrb[10].mxu0 %vm209_vm0, %v3064_v21  ;;  %2741 = vmatmul.mubr.msk.f32.gmra.mrb[10].mxu1 %vm209_vm0, %v3064_v21 }
  0x58   : > { %2679 = vmatprep.mubr.msk.f32.mxu0 %vm209_vm0, %v3071_v22  ;;  %2743 = vmatprep.mubr.msk.f32.mxu1 %vm209_vm0, %v3071_v22 }
  0x5b   : > { %2680 = vmatmul.mubr.msk.f32.gmra.mrb[12].mxu0 %vm209_vm0, %v3082_v23  ;;  %2744 = vmatmul.mubr.msk.f32.gmra.mrb[12].mxu1 %vm209_vm0, %v3082_v23 }
  0x5c   : > { %2682 = vmatprep.mubr.msk.f32.mxu0 %vm209_vm0, %v3085_v24  ;;  %2746 = vmatprep.mubr.msk.f32.mxu1 %vm209_vm0, %v3085_v24 }
  0x5f   : > { %2683 = vmatmul.mubr.msk.f32.gmra.mrb[14].mxu0 %vm209_vm0, %v3096_v25  ;;  %2747 = vmatmul.mubr.msk.f32.gmra.mrb[14].mxu1 %vm209_vm0, %v3096_v25 }
  0x60   : > { %2689 = vmatprep.mubr.msk.f32.mxu0 %vm209_vm0, %v3099_v26  ;;  %2753 = vmatprep.mubr.msk.f32.mxu1 %vm209_vm0, %v3099_v26 }
  0x63   : > { %2690 = vmatmul.mubr.msk.f32.vlgmr.msra.gmra.mrb[8].mxu0 %vm209_vm0, %v3122_v31  ;;  %2754 = vmatmul.mubr.msk.f32.vlgmr.msra.gmra.mrb[8].mxu1 %vm209_vm0, %v3122_v31 }
  0x64   : > { %2840 = vmatpush3.bf16.msra.mxu0 %v2837_v58  ;;  %2856 = vmatpush3.bf16.msra.mxu1 %v2853_v59 }
  0x65   : > { %2692 = vmatprep.mubr.msk.f32.mxu0 %vm209_vm0, %v3125_v32  ;;  %2756 = vmatprep.mubr.msk.f32.mxu1 %vm209_vm0, %v3125_v32 }
  0x66   : > { %2842 = vmatprep.subr.bf16.mxu0 %v2841_v0  ;;  %2858 = vmatprep.subr.bf16.mxu1 %v2857_v1 }
  0x67   : > { %2693 = vmatmul.mubr.msk.f32.gmra.mrb[10].mxu0 %vm209_vm0, %v3132_v35  ;;  %2757 = vmatmul.mubr.msk.f32.gmra.mrb[10].mxu1 %vm209_vm0, %v3132_v35 }
  0x68   : > { %2695 = vmatprep.mubr.msk.f32.mxu0 %vm209_vm0, %v3139_v36  ;;  %2759 = vmatprep.mubr.msk.f32.mxu1 %vm209_vm0, %v3139_v36 }
  0x6b   : > { %2696 = vmatmul.mubr.msk.f32.gmra.mrb[12].mxu0 %vm209_vm0, %v3150_v37  ;;  %2760 = vmatmul.mubr.msk.f32.gmra.mrb[12].mxu1 %vm209_vm0, %v3150_v37 }
  0x6c   : > { %2698 = vmatprep.mubr.msk.f32.mxu0 %vm209_vm0, %v3153_v38  ;;  %2762 = vmatprep.mubr.msk.f32.mxu1 %vm209_vm0, %v3153_v38 }
  0x6f   : > { %2699 = vmatmul.mubr.msk.f32.gmra.mrb[14].mxu0 %vm209_vm0, %v3164_v39  ;;  %2763 = vmatmul.mubr.msk.f32.gmra.mrb[14].mxu1 %vm209_vm0, %v3164_v39 }
  0x70   : > { %2705 = vmatprep.mubr.msk.f32.mxu0 %vm209_vm0, %v3122_v31  ;;  %2769 = vmatprep.mubr.msk.f32.mxu1 %vm209_vm0, %v3122_v31  ;;  %v2377_v31 = vld [vmem:[%s3446_s2] ss:$0 sm:$0xff] }
  0x73   : > { %2706 = vmatmul.mubr.msk.f32.vlgmr.msra.gmra.mrb[8].mxu0 %vm209_vm0, %v3125_v32  ;;  %2770 = vmatmul.mubr.msk.f32.vlgmr.msra.gmra.mrb[8].mxu1 %vm209_vm0, %v3125_v32 }
  0x74   : > { %2844 = vmatpush3.bf16.msra.mxu0 %v2841_v0  ;;  %2860 = vmatpush3.bf16.msra.mxu1 %v2857_v1 }
  0x75   : > { %2708 = vmatprep.mubr.msk.f32.mxu0 %vm209_vm0, %v3132_v35  ;;  %2772 = vmatprep.mubr.msk.f32.mxu1 %vm209_vm0, %v3132_v35 }
  0x77   : > { %2709 = vmatmul.mubr.msk.f32.gmra.mrb[10].mxu0 %vm209_vm0, %v3139_v36  ;;  %2773 = vmatmul.mubr.msk.f32.gmra.mrb[10].mxu1 %vm209_vm0, %v3139_v36 }
  0x78   : > { %2711 = vmatprep.mubr.msk.f32.mxu0 %vm209_vm0, %v3150_v37  ;;  %2775 = vmatprep.mubr.msk.f32.mxu1 %vm209_vm0, %v3150_v37 }
  0x7b   : > { %2712 = vmatmul.mubr.msk.f32.gmra.mrb[12].mxu0 %vm209_vm0, %v3153_v38  ;;  %2776 = vmatmul.mubr.msk.f32.gmra.mrb[12].mxu1 %vm209_vm0, %v3153_v38 }
  0x7c   : > { %2714 = vmatprep.mubr.msk.f32.mxu0 %vm209_vm0, %v3164_v39  ;;  %2778 = vmatprep.mubr.msk.f32.mxu1 %vm209_vm0, %v3164_v39 }
  0x7f   : > { %2715 = vmatmul.mubr.msk.f32.gmra.mrb[14].mxu0 %vm209_vm0, %v3211_v46  ;;  %2779 = vmatmul.mubr.msk.f32.gmra.mrb[14].mxu1 %vm209_vm0, %v3211_v46 }
  0x80   : > { %2721 = vmatprep.mubr.msk.f32.mxu0 %vm209_vm0, %v3050_v17  ;;  %2785 = vmatprep.mubr.msk.f32.mxu1 %vm209_vm0, %v3050_v17 }
  0x83   : > { %2722 = vmatmul.mubr.msk.f32.vlgmr.msra.gmra.mrb[8].mxu0 %vm209_vm0, %v3057_v18  ;;  %2786 = vmatmul.mubr.msk.f32.vlgmr.msra.gmra.mrb[8].mxu1 %vm209_vm0, %v3057_v18 }
  0x84   : > { %2724 = vmatprep.mubr.msk.f32.mxu0 %vm209_vm0, %v3064_v21  ;;  %2788 = vmatprep.mubr.msk.f32.mxu1 %vm209_vm0, %v3064_v21 }
  0x87   : > { %2725 = vmatmul.mubr.msk.f32.gmra.mrb[10].mxu0 %vm209_vm0, %v3071_v22  ;;  %2789 = vmatmul.mubr.msk.f32.gmra.mrb[10].mxu1 %vm209_vm0, %v3071_v22 }
  0x88   : > { %2727 = vmatprep.mubr.msk.f32.mxu0 %vm209_vm0, %v3082_v23  ;;  %2791 = vmatprep.mubr.msk.f32.mxu1 %vm209_vm0, %v3082_v23 }
  0x8b   : > { %2728 = vmatmul.mubr.msk.f32.gmra.mrb[12].mxu0 %vm209_vm0, %v3085_v24  ;;  %2792 = vmatmul.mubr.msk.f32.gmra.mrb[12].mxu1 %vm209_vm0, %v3085_v24 }
  0x8c   : > { %2730 = vmatprep.mubr.msk.f32.mxu0 %vm209_vm0, %v3096_v25  ;;  %2794 = vmatprep.mubr.msk.f32.mxu1 %vm209_vm0, %v3096_v25 }
  0x8f   : > { %2731 = vmatmul.mubr.msk.f32.gmra.mrb[14].mxu0 %vm209_vm0, %v3258_v53  ;;  %2795 = vmatmul.mubr.msk.f32.gmra.mrb[14].mxu1 %vm209_vm0, %v3258_v53 }
 0x116   : > { %v2595_v2 = vpop.f32.mrb[0].mxu0  ;;  %v2659_v3 = vpop.f32.mrb[0].mxu1 }
 0x117   : > { %v1197_v4 = vmax.f32 %v2595_v2, %v2659_v3  ;;  %v701_v5 = vpop.f32.mrb[1].mxu0  ;;  %v1149_v6 = vpop.f32.mrb[1].mxu1 }
 0x118   : > { %v1196_v7 = vmax.f32 %v701_v5, %v1149_v6 }
 0x11a   : > { %v2598_v8 = vpop.f32.mrb[2].mxu0  ;;  %v2662_v9 = vpop.f32.mrb[2].mxu1 }
 0x11b   : > { %v1199_v10 = vmax.f32 %v2598_v8, %v2662_v9  ;;  %v711_v11 = vpop.f32.mrb[3].mxu0  ;;  %v1159_v12 = vpop.f32.mrb[3].mxu1 }
 0x11c   : > { %v1198_v13 = vmax.f32 %v711_v11, %v1159_v12 }
 0x11e   : > { %v2601_v14 = vpop.f32.mrb[4].mxu0  ;;  %v2665_v15 = vpop.f32.mrb[4].mxu1 }
 0x11f   : > { %v1201_v16 = vmax.f32 %v2601_v14, %v2665_v15  ;;  %v721_v17 = vpop.f32.mrb[5].mxu0  ;;  %v1169_v18 = vpop.f32.mrb[5].mxu1 }
 0x120   : > { %v1200_v19 = vmax.f32 %v721_v17, %v1169_v18 }
 0x122   : > { %v2604_v20 = vpop.f32.mrb[6].mxu0  ;;  %v2668_v21 = vpop.f32.mrb[6].mxu1 }
 0x123   : > { %v1203_v22 = vmax.f32 %v2604_v20, %v2668_v21  ;;  %v731_v23 = vpop.f32.mrb[7].mxu0  ;;  %v1179_v24 = vpop.f32.mrb[7].mxu1 }
 0x124   : > { %v1202_v25 = vmax.f32 %v731_v23, %v1179_v24 }
 0x156   : > { %v2723_v26 = vpop.f32.mrb[8].mxu0  ;;  %v2787_v27 = vpop.f32.mrb[8].mxu1 }
 0x157   : > { %v1653_v28 = vmax.f32 %v1197_v4, %v2723_v26  ;;  %v1605_v29 = vpop.f32.mrb[9].mxu0  ;;  %v2061_v30 = vpop.f32.mrb[9].mxu1 }
 0x158   : > { %v1652_v32 = vmax.f32 %v1196_v7, %v1605_v29 }
 0x159   : > { %v2109_v33 = vmax.f32 %v1653_v28, %v2787_v27 }
 0x15a   : > { %v2108_v34 = vmax.f32 %v1652_v32, %v2061_v30  ;;  %v2726_v35 = vpop.f32.mrb[10].mxu0  ;;  %v2790_v36 = vpop.f32.mrb[10].mxu1 }
 0x15b   : > { %v2124_v37 = vadd.f32 %v2377_v31, %v2109_v33  ;;  %v1655_v38 = vmax.f32 %v1199_v10, %v2726_v35  ;;  %v1615_v39 = vpop.f32.mrb[11].mxu0  ;;  %v2071_v40 = vpop.f32.mrb[11].mxu1 }
 0x15c   : > { %v2123_v41 = vadd.f32 %v2377_v31, %v2108_v34  ;;  %v1654_v42 = vmax.f32 %v1198_v13, %v1615_v39 }
 0x15d   : > { %2133 = vst.msk [vmem:[%s3423_s10 + $0x8] sm:$0xff] %vm2131_vm1, %v2124_v37  ;;  %v2111_v43 = vmax.f32 %v1655_v38, %v2790_v36 }
 0x15e   : > { %2132 = vst.msk [vmem:[%s3423_s10] sm:$0xff] %vm2131_vm1, %v2123_v41  ;;  %v2110_v44 = vmax.f32 %v1654_v42, %v2071_v40  ;;  %v2729_v45 = vpop.f32.mrb[12].mxu0  ;;  %v2793_v46 = vpop.f32.mrb[12].mxu1 }
 0x15f   : > { %v2126_v47 = vadd.f32 %v2377_v31, %v2111_v43  ;;  %v1657_v48 = vmax.f32 %v1201_v16, %v2729_v45  ;;  %v1625_v49 = vpop.f32.mrb[13].mxu0  ;;  %v2081_v50 = vpop.f32.mrb[13].mxu1 }
 0x160   : > { %v2125_v51 = vadd.f32 %v2377_v31, %v2110_v44  ;;  %v1656_v52 = vmax.f32 %v1200_v19, %v1625_v49 }
 0x161   : > { %2135 = vst.msk [vmem:[%s3423_s10 + $0x18] sm:$0xff] %vm2131_vm1, %v2126_v47  ;;  %v2113_v53 = vmax.f32 %v1657_v48, %v2793_v46 }
 0x162   : > { %2134 = vst.msk [vmem:[%s3423_s10 + $0x10] sm:$0xff] %vm2131_vm1, %v2125_v51  ;;  %v2112_v54 = vmax.f32 %v1656_v52, %v2081_v50  ;;  %v2732_v55 = vpop.f32.mrb[14].mxu0  ;;  %v2796_v56 = vpop.f32.mrb[14].mxu1 }
 0x163   : > { %v2128_v57 = vadd.f32 %v2377_v31, %v2113_v53  ;;  %v1659_v58 = vmax.f32 %v1203_v22, %v2732_v55  ;;  %v1635_v59 = vpop.f32.mrb[15].mxu0  ;;  %v2091_v60 = vpop.f32.mrb[15].mxu1 }
 0x164   : > { %v2127_v61 = vadd.f32 %v2377_v31, %v2112_v54  ;;  %v1658_v62 = vmax.f32 %v1202_v25, %v1635_v59 }
 0x165   : > { %2137 = vst.msk [vmem:[%s3423_s10 + $0x28] sm:$0xff] %vm2131_vm1, %v2128_v57  ;;  %v2115_v63 = vmax.f32 %v1659_v58, %v2796_v56 }
 0x166   : > { %2136 = vst.msk [vmem:[%s3423_s10 + $0x20] sm:$0xff] %vm2131_vm1, %v2127_v61  ;;  %v2114_v0 = vmax.f32 %v1658_v62, %v2091_v60 }
 0x167   : > { %v2130_v1 = vadd.f32 %v2377_v31, %v2115_v63 }
 0x168   : > { %v2129_v2 = vadd.f32 %v2377_v31, %v2114_v0 }
 0x169   : > { %2139 = vst.msk [vmem:[%s3423_s10 + $0x38] sm:$0xff] %vm2131_vm1, %v2130_v1 }
 0x16a   : > { %2138 = vst.msk [vmem:[%s3423_s10 + $0x30] sm:$0xff] %vm2131_vm1, %v2129_v2 }
 0x16b PF: > { %s13_s12 = sadd.s32 1, %s2972_s12  }
 0x16c   : > { %p10_p4 = scmp.ge.s32.totalorder %s13_s12, 4  }
 0x16e   :  { %12 = sbr.rel (!%p10_p4) target bundleno = 1 (0x1), region = 78 }

</bundles_post_ra>
